<compile_context>
chip_gen: v6e
topology: v6e:2x2x1
jax: 0.10.0
libtpu: 0.0.40
codegen_flags: <defaults>
</compile_context>

<pallas_src>
import math

import jax
import jax.numpy as jnp
import numpy as np
from jax.experimental import pallas as pl
from jax.experimental.pallas import tpu as pltpu


# --------------------------- parameter preparation ---------------------------

def prepare_params(params, num_heads, compute_dtype=jnp.bfloat16):
    """Fold scaling + de-interleave permutation into weights; pre-transpose."""
    in_w = params["in_proj_weight"]      # (3E, E)  PyTorch layout
    in_b = params["in_proj_bias"]        # (3E,)
    out_w = params["out_proj_weight"]    # (E, E)
    out_b = params["out_proj_bias"]      # (E,)
    E = in_w.shape[1]
    H = num_heads
    Dh = E // H
    scaling = Dh ** -0.5

    # Per-head de-interleave of output features: evens first, then odds.
    # Applying the same permutation to q and k keeps q.k^T invariant and turns
    # the interleaved rotary of the reference into a half-split rotary.
    base = jnp.arange(Dh)
    deint = jnp.concatenate([base[0::2], base[1::2]])                    # (Dh,)
    perm_e = (jnp.arange(H)[:, None] * Dh + deint[None, :]).reshape(E)   # (E,)

    q_w = in_w[:E][perm_e] * scaling          # scaling folded into q rows
    q_b = in_b[:E][perm_e] * scaling
    k_w = in_w[E:2 * E][perm_e]
    k_b = in_b[E:2 * E][perm_e]
    v_w = in_w[2 * E:]
    v_b = in_b[2 * E:]
    in_w_folded = jnp.concatenate([q_w, k_w, v_w], axis=0)               # (3E, E)
    in_b_folded = jnp.concatenate([q_b, k_b, v_b], axis=0)               # (3E,)

    return {
        "compute_dtype": compute_dtype,
        "in_proj_wT": in_w_folded.T.astype(compute_dtype),               # (E, 3E)
        "in_proj_b": in_b_folded.reshape(1, -1).astype(jnp.float32),     # (1, 3E)
        "out_proj_wT": out_w.T.astype(compute_dtype),                    # (E, E)
        "out_proj_b": out_b.reshape(1, -1).astype(jnp.float32),          # (1, E)
        "num_heads": H,
    }


# ------------------------------- linear kernel -------------------------------

def _linear_kernel(x_ref, wt_ref, b_ref, o_ref):
    # y = x @ W^T + b, accumulate in f32 regardless of input dtype.
    acc = jnp.dot(x_ref[...], wt_ref[...], preferred_element_type=jnp.float32)
    o_ref[...] = (acc + b_ref[...]).astype(o_ref.dtype)


def _pick_block_m(m, target):
    """Largest multiple-of-8 divisor of m that is <= target (else full m)."""
    if m <= target:
        return m
    bm = (target // 8) * 8
    while bm >= 8:
        if m % bm == 0:
            return bm
        bm -= 8
    return m


def pallas_linear(x, wT, b, *, out_dtype, block_m=256):
    """x: (M, K), wT: (K, N) pre-transposed, b: (1, N) f32 -> (M, N)."""
    M, K = x.shape
    N = wT.shape[1]
    bm = _pick_block_m(M, block_m)
    return pl.pallas_call(
        _linear_kernel,
        out_shape=jax.ShapeDtypeStruct((M, N), out_dtype),
        grid=(M // bm,),
        in_specs=[
            pl.BlockSpec((bm, K), lambda i: (i, 0)),
            pl.BlockSpec((K, N), lambda i: (0, 0)),   # resident: no re-DMA
            pl.BlockSpec((1, N), lambda i: (0, 0)),   # resident: no re-DMA
        ],
        out_specs=pl.BlockSpec((bm, N), lambda i: (i, 0)),
        compiler_params=pltpu.CompilerParams(dimension_semantics=("parallel",)),
    )(x, wT, b)


# ----------------------------- attention kernel ------------------------------

def _make_attn_kernel(num_heads, head_dim, need_weights):
    H, Dh = num_heads, head_dim
    half = Dh // 2

    def body(q_ref, k_ref, v_ref, sq_ref, cq_ref, sk_ref, ck_ref, o_ref, w_ref):
        # q_ref: (Tq, E) lane-dense; k_ref/v_ref: (S, E) lane-dense
        # sq/cq: (Tq, Dh)  sk/ck: (S, Dh)  [-sin|+sin] sign already folded
        # o_ref: (Tq, E);  w_ref: (H, Tq, S) or None

        def split_heads(x):
            # (rows, E) -> (H, rows, Dh): static lane slices stacked on a new
            # LEADING axis (no lane/sublane relayout of the minor dims).
            return jnp.stack([x[:, h * Dh:(h + 1) * Dh] for h in range(H)],
                             axis=0)

        def rotary(xh, sin, cos):
            # xh: (H, rows, Dh); single pass over all heads.
            swapped = jnp.concatenate([xh[..., half:], xh[..., :half]], axis=-1)
            return xh * cos[None] + swapped * sin[None]

        qh = rotary(split_heads(q_ref[...]), sq_ref[...], cq_ref[...])  # (H,Tq,Dh)
        kh = rotary(split_heads(k_ref[...]), sk_ref[...], ck_ref[...])  # (H,S ,Dh)
        vh = split_heads(v_ref[...])                                    # (H,S ,Dh)

        # Head-batched scores on the MXU, f32 accumulation.
        s = jnp.einsum("hqd,hkd->hqk", qh, kh,
                       preferred_element_type=jnp.float32)              # (H,Tq,S)
        m = jnp.max(s, axis=-1, keepdims=True)
        e = jnp.exp(s - m)
        denom = jnp.sum(e, axis=-1, keepdims=True)
        inv = pl.reciprocal(denom, approx=True)                         # EUP slot

        # Deferred normalization: PV with unnormalized exponentials, then scale
        # the small (H, Tq, Dh) context instead of the (H, Tq, S) probs.
        ctx = jnp.einsum("hqk,hkd->hqd", e.astype(vh.dtype), vh,
                         preferred_element_type=jnp.float32)            # (H,Tq,Dh)
        ctx = ctx * inv

        # Single lane-dense (Tq, E) store.
        o_ref[...] = jnp.concatenate([ctx[h] for h in range(H)],
                                     axis=-1).astype(o_ref.dtype)

        if w_ref is not None:
            w_ref[...] = (e * inv).astype(w_ref.dtype)

    if need_weights:
        return body
    return lambda *refs: body(*refs, None)


def pallas_roformer_attention(qkv, sin_signed, cos_full, *, num_heads,
                              need_weights, block_q=256):
    """qkv: (T, B, 3, E); sin/cos: (T, Dh).  Returns (ctx (T,B,E), probs|None)."""
    T, B, _, E = qkv.shape
    H = num_heads
    Dh = E // H
    S = T
    Tq = _pick_block_m(T, block_q)
    nq = T // Tq
    kernel = _make_attn_kernel(H, Dh, need_weights)

    in_specs = [
        # lane-dense (rows, E) slabs of q / k / v (same HBM array, 3 views)
        pl.BlockSpec((Tq, None, None, E), lambda b, i: (i, b, 0, 0)),
        pl.BlockSpec((T, None, None, E), lambda b, i: (0, b, 1, 0)),
        pl.BlockSpec((T, None, None, E), lambda b, i: (0, b, 2, 0)),
        # rotary constants: q-tile view and full-S view of the same arrays
        pl.BlockSpec((Tq, Dh), lambda b, i: (i, 0)),
        pl.BlockSpec((Tq, Dh), lambda b, i: (i, 0)),
        pl.BlockSpec((T, Dh), lambda b, i: (0, 0)),
        pl.BlockSpec((T, Dh), lambda b, i: (0, 0)),
    ]
    ctx_shape = jax.ShapeDtypeStruct((T, B, E), qkv.dtype)
    ctx_spec = pl.BlockSpec((Tq, None, E), lambda b, i: (i, b, 0))
    cparams = pltpu.CompilerParams(
        dimension_semantics=("parallel", "parallel"),
        vmem_limit_bytes=64 * 1024 * 1024)
    args = (qkv, qkv, qkv, sin_signed, cos_full, sin_signed, cos_full)

    if need_weights:
        w_shape = jax.ShapeDtypeStruct((B, H, T, S), qkv.dtype)
        w_spec = pl.BlockSpec((None, H, Tq, S), lambda b, i: (b, 0, i, 0))
        ctx, w = pl.pallas_call(
            kernel,
            out_shape=(ctx_shape, w_shape),
            grid=(B, nq),
            in_specs=in_specs,
            out_specs=(ctx_spec, w_spec),
            compiler_params=cparams,
        )(*args)
        return ctx, w

    ctx = pl.pallas_call(
        kernel,
        out_shape=ctx_shape,
        grid=(B, nq),
        in_specs=in_specs,
        out_specs=ctx_spec,
        compiler_params=cparams,
    )(*args)
    return ctx, None


# ------------------------------- forward glue --------------------------------

def roformer_mha_forward(query, rel_pos, prep, num_heads, *, need_weights=True):
    """Self-attention forward.  query: (T, B, E), rel_pos: (T, Dh)."""
    T, B, E = query.shape
    H = num_heads
    Dh = E // H
    cdt = prep["compute_dtype"]

    # in-projection: scaling + de-interleave already folded into the weights.
    x = query.reshape(T * B, E).astype(cdt)
    qkv = pallas_linear(x, prep["in_proj_wT"], prep["in_proj_b"], out_dtype=cdt)
    qkv = qkv.reshape(T, B, 3, E)                   # free view, no HBM copy

    # sin/cos constants: half-split layout with the rotate-half sign folded in.
    sin = rel_pos[:, : Dh // 2]
    cos = rel_pos[:, Dh // 2:]
    sin_signed = jnp.concatenate([-sin, sin], axis=-1).astype(cdt)   # (T, Dh)
    cos_full = jnp.concatenate([cos, cos], axis=-1).astype(cdt)      # (T, Dh)

    ctx, probs = pallas_roformer_attention(
        qkv, sin_signed, cos_full, num_heads=H, need_weights=need_weights)

    # out-projection: ctx is already lane-dense (T, B, E) -> free reshape.
    attn = pallas_linear(
        ctx.reshape(T * B, E), prep["out_proj_wT"], prep["out_proj_b"],
        out_dtype=jnp.float32).reshape(T, B, E)

    # This module returns per-head weights (B, H, T, S) (no head averaging).
    return attn, probs


# ----------------------------- pure-JAX reference ----------------------------

def reference_forward(query, rel_pos, params, num_heads):
    T, B, E = query.shape
    H = num_heads
    Dh = E // H
    scaling = Dh ** -0.5
    x = query.reshape(T * B, E)
    qkv = x @ params["in_proj_weight"].T + params["in_proj_bias"]
    q, k, v = jnp.split(qkv, 3, axis=-1)
    q = q * scaling

    def to_heads(t):
        return t.reshape(T, B * H, Dh).transpose(1, 0, 2)

    q, k, v = to_heads(q), to_heads(k), to_heads(v)

    sin, cos = jnp.split(rel_pos, 2, axis=-1)
    sin_pos = jnp.stack([sin, sin], axis=-1).reshape(T, Dh)
    cos_pos = jnp.stack([cos, cos], axis=-1).reshape(T, Dh)

    def rot_half(t):
        return jnp.stack([-t[..., 1::2], t[..., ::2]], axis=-1).reshape(t.shape)

    q = q * cos_pos + rot_half(q) * sin_pos
    k = k * cos_pos + rot_half(k) * sin_pos

    scores = jnp.einsum("btd,bsd->bts", q, k)
    p = jax.nn.softmax(scores, axis=-1)
    attn = jnp.einsum("bts,bsd->btd", p, v)
    attn = attn.transpose(1, 0, 2).reshape(T, B, E)
    attn = attn @ params["out_proj_weight"].T + params["out_proj_bias"]
    return attn, p.reshape(B, H, T, T)


# ------------------------------------ main -----------------------------------

def xavier_uniform(key, shape):
    fan_out, fan_in = shape
    bound = math.sqrt(6.0 / (fan_in + fan_out))
    return jax.random.uniform(key, shape, jnp.float32, -bound, bound)


if __name__ == "__main__":
    T, B, E, H = 8, 2, 64, 2            # tgt_len, batch, embed_dim, num_heads
    Dh = E // H

    key = jax.random.PRNGKey(0)
    k1, k2, k3 = jax.random.split(key, 3)
    params = {
        "in_proj_weight": xavier_uniform(k1, (3 * E, E)),
        "in_proj_bias": jnp.zeros((3 * E,), jnp.float32),   # constant_(0)
        "out_proj_weight": xavier_uniform(k2, (E, E)),
        "out_proj_bias": jnp.zeros((E,), jnp.float32),
    }
    query = jax.random.normal(k3, (T, B, E), dtype=jnp.float32)

    # sinusoidal_pos with [sin | cos] halves along the last dim.
    pos = jnp.arange(T, dtype=jnp.float32)[:, None]
    inv_freq = 1.0 / (10000.0 ** (jnp.arange(0, Dh, 2, dtype=jnp.float32) / Dh))
    ang = pos * inv_freq[None, :]
    rel_pos = jnp.concatenate([jnp.sin(ang), jnp.cos(ang)], axis=-1)  # (T, Dh)

    ref_attn, ref_w = reference_forward(query, rel_pos, params, H)

    # --- f32 verification path (tight tolerances; approx reciprocal only) ----
    prep32 = prepare_params(params, H, compute_dtype=jnp.float32)
    attn32, w32 = roformer_mha_forward(query, rel_pos, prep32, H,
                                       need_weights=True)
    jax.block_until_ready((attn32, w32))
    assert attn32.shape == (T, B, E)
    assert w32.shape == (B, H, T, T)
    assert np.allclose(np.asarray(attn32), np.asarray(ref_attn),
                       rtol=5e-3, atol=5e-3)
    assert np.allclose(np.asarray(w32), np.asarray(ref_w),
                       rtol=5e-3, atol=5e-3)

    # --- bf16 fast path (bf16 MXU inputs, f32 accumulation / softmax stats) --
    prep16 = prepare_params(params, H, compute_dtype=jnp.bfloat16)
    attn16, w16 = roformer_mha_forward(query, rel_pos, prep16, H,
                                       need_weights=True)
    jax.block_until_ready((attn16, w16))
    assert np.allclose(np.asarray(attn16.astype(jnp.float32)),
                       np.asarray(ref_attn), rtol=5e-2, atol=5e-2)
    assert np.allclose(np.asarray(w16.astype(jnp.float32)),
                       np.asarray(ref_w), rtol=5e-2, atol=5e-2)

    # --- need_weights=False path (no (B,H,T,S) HBM writeback at all) ---------
    attn_nw, w_nw = roformer_mha_forward(query, rel_pos, prep16, H,
                                         need_weights=False)
    jax.block_until_ready(attn_nw)
    assert w_nw is None
    assert np.allclose(np.asarray(attn_nw), np.asarray(ref_attn),
                       rtol=5e-2, atol=5e-2)

    print("KERNEL_OK")
</pallas_src>

<mosaic_0001>
module attributes {stable_mosaic.version = 11 : i64} {
  func.func @_linear_kernel(%arg0: i32, %arg1: memref<16x64xf32, #tpu.memory_space<vmem>>, %arg2: memref<64x192xf32, #tpu.memory_space<vmem>>, %arg3: memref<1x192xf32, #tpu.memory_space<vmem>>, %arg4: memref<16x192xf32, #tpu.memory_space<vmem>>) attributes {dimension_semantics = [#tpu.dimension_semantics<parallel>], iteration_bounds = array<i64: 1>, scalar_prefetch = 0 : i64, scratch_operands = 0 : i64, tpu.core_type = #tpu.core_type<tc>, window_params = [{transform_indices = @transform_0, window_bounds = array<i64: 16, 64>}, {pipeline_mode = #tpu.pipeline_mode<synchronous>, transform_indices = @transform_1, window_bounds = array<i64: 64, 192>}, {pipeline_mode = #tpu.pipeline_mode<synchronous>, transform_indices = @transform_2, window_bounds = array<i64: 1, 192>}, {transform_indices = @transform_3, window_bounds = array<i64: 16, 192>}]} {
    %c0 = arith.constant 0 : index
    %c0_0 = arith.constant 0 : index
    %0 = vector.load %arg1[%c0, %c0_0] : memref<16x64xf32, #tpu.memory_space<vmem>>, vector<16x64xf32>
    %c0_1 = arith.constant 0 : index
    %c0_2 = arith.constant 0 : index
    %1 = vector.load %arg2[%c0_1, %c0_2] : memref<64x192xf32, #tpu.memory_space<vmem>>, vector<64x192xf32>
    %cst = arith.constant dense<0.000000e+00> : vector<16x192xf32>
    %2 = tpu.matmul %0, %1, %cst {dimension_numbers = #tpu.dot_dimension_numbers<[1], [0], [0], [1], [0, 0, 1, 1], [], []>} : vector<16x64xf32>, vector<64x192xf32>, vector<16x192xf32> -> vector<16x192xf32>
    %c0_3 = arith.constant 0 : index
    %c0_4 = arith.constant 0 : index
    %3 = vector.load %arg3[%c0_3, %c0_4] : memref<1x192xf32, #tpu.memory_space<vmem>>, vector<1x192xf32>
    %4 = vector.broadcast %3 : vector<1x192xf32> to vector<16x192xf32>
    %5 = arith.addf %2, %4 : vector<16x192xf32>
    %c0_5 = arith.constant 0 : index
    %c0_6 = arith.constant 0 : index
    %6 = vector.load %arg4[%c0_5, %c0_6] : memref<16x192xf32, #tpu.memory_space<vmem>>, vector<16x192xf32>
    tpu.vector_store %arg4[%c0_5, %c0_6], %5 {strides = array<i32>} : memref<16x192xf32, #tpu.memory_space<vmem>>, vector<16x192xf32>,
    return
  }
  func.func @transform_0(%arg0: i32) -> (i32, i32) {
    %c0_i32 = arith.constant 0 : i32
    %c0_i32_0 = arith.constant 0 : i32
    return %arg0, %c0_i32 : i32, i32
  }
  func.func @transform_1(%arg0: i32) -> (i32, i32) {
    %c0_i32 = arith.constant 0 : i32
    %c0_i32_0 = arith.constant 0 : i32
    %c0_i32_1 = arith.constant 0 : i32
    return %c0_i32, %c0_i32_0 : i32, i32
  }
  func.func @transform_2(%arg0: i32) -> (i32, i32) {
    %c0_i32 = arith.constant 0 : i32
    %c0_i32_0 = arith.constant 0 : i32
    %c0_i32_1 = arith.constant 0 : i32
    return %c0_i32, %c0_i32_0 : i32, i32
  }
  func.func @transform_3(%arg0: i32) -> (i32, i32) {
    %c0_i32 = arith.constant 0 : i32
    %c0_i32_0 = arith.constant 0 : i32
    return %arg0, %c0_i32 : i32, i32
  }
}

</mosaic_0001>

<bundles_post_ra>
// kernel: tpu_custom_call.1
= control target key start
LH: loop header
LB: loop body
LE: loop exit
PB: predicated region body
PF: predicated region fallthrough
CT: control target
= control target key end

     0   :  { %8 = vsyncpa [#allocation3], 0  ;;  %s321_s0 = inlined_call_operand.hbm [shape: f32[16,64], index: 0, kind: input, shape index: {}]   ;;  %s322_s1 = inlined_call_operand.hbm [shape: f32[64,192], index: 1, kind: input, shape index: {}]   ;;  %s323_s2 = inlined_call_operand.vmem [shape: f32[1,192], index: 2, kind: input, shape index: {}]   ;;  %s324_s3 = inlined_call_operand.hbm [shape: f32[16,192], index: 3, kind: output, shape index: {}]  }
   0x1   :  { %9 = vsyncpa [#allocation6], 0 }
   0x2   :  { %10 = vsyncpa [#allocation4], 0  ;;  %s271_s12 = smov [#allocation2]  }
   0x3   :  { %s16_s13 = sshll.u32 %s271_s12, 4  ;;  %s17_s13 = int_to_ptr.vmem [resolvable:$true] %s16_s13 }
   0x4   :  { %s213_s14 = scalar_lea.vmem %s17_s13, 256  ;;  %p218_p1 = scmp.lt.s32.totalorder %s17_s13, %s17_s13 }
   0x5   :  { %p214_p0 = scmp.ne.s32.totalorder %s17_s13, %s213_s14  ;;  %p219_p2 = scmp.lt.s32.totalorder %s213_s14, %s213_s14 }
   0x7   :  { %p220_p3 = por %p219_p2, %p218_p1 }
   0x9   :  { %p221_p4 = pnand %p220_p3, %p214_p0 }
   0xb   :  { %224 = shalt.err (!%p221_p4)
}
   0xc   :  { %s272_s15 = smov 128   ;;  %s273_s16 = smov 8  }
   0xd   :  { %22 = dma.hbm_to_vmem [thread:$0]  %s321_s0, 256, %s17_s13, [#allocation3], %s272_s15, %s272_s15, %s273_s16  }
   0xe   :  { %s274_s19 = smov [#allocation5]  }
   0xf   :  { %s28_s20 = sshll.u32 %s274_s19, 4  ;;  %s29_s20 = int_to_ptr.vmem [resolvable:$true] %s28_s20 }
  0x10   :  { %s233_s21 = scalar_lea.vmem %s29_s20, 2048  ;;  %p238_p6 = scmp.lt.s32.totalorder %s29_s20, %s29_s20 }
  0x11   :  { %p234_p5 = scmp.ne.s32.totalorder %s29_s20, %s233_s21  ;;  %p239_p7 = scmp.lt.s32.totalorder %s233_s21, %s233_s21 }
  0x13   :  { %p240_p8 = por %p239_p7, %p238_p6 }
  0x15   :  { %p241_p9 = pnand %p240_p8, %p234_p5 }
  0x17   :  { %244 = shalt.err (!%p241_p9)
}
  0x18   :  { %s275_s22 = smov 256   ;;  %s276_s23 = smov 16  }
  0x19   :  { %34 = dma.hbm_to_vmem [thread:$0]  %s322_s1, 2048, %s29_s20, [#allocation6], %s275_s22, %s275_s22, %s276_s23  }
  0x1a   :  { %265 = dma.done.wait [#allocation3], 256  }
  0x1b   :  { %266 = vsyncadd [#allocation3], 4294967040 }
  0x1c   :  { %267 = dma.done.wait [#allocation6], 2048  }
  0x1d   :  { %268 = vsyncadd [#allocation6], 4294965248  ;;  %v277_v0 = vmov 0.0   ;;  %v60_v1 = vld [vmem:[#allocation5 + $0x78] sm:$0xff]  ;;  %v59_v2 = vld [vmem:[#allocation5 + $0x70] sm:$0xff]  ;;  %vm73_vm0 = vcmask 523264   ;;  %v63_v19 = vlaneseq }
  0x1e   :  { %144 = vmatprep.mubr.f32.mxu0 %v277_v0  ;;  %150 = vmatprep.mubr.f32.mxu1 %v277_v0  ;;  %v58_v3 = vld [vmem:[#allocation5 + $0x68] sm:$0xff]  ;;  %v57_v4 = vld [vmem:[#allocation5 + $0x60] sm:$0xff]  ;;  %v56_v5 = vld [vmem:[#allocation5 + $0x58] sm:$0xff]  ;;  %s278_s26 = smov [#allocation7]  }
  0x1f   :  { %96 = vmatprep.subr.mxu0 %v60_v1  ;;  %181 = vmatprep.subr.mxu1 %v60_v1  ;;  %v55_v6 = vld [vmem:[#allocation5 + $0x50] sm:$0xff]  ;;  %v54_v7 = vld [vmem:[#allocation5 + $0x48] sm:$0xff]  ;;  %v53_v8 = vld [vmem:[#allocation5 + $0x40] sm:$0xff]  ;;  %v64_v20 = vshrl.u32 %v63_v19, 7  ;;  %s166_s27 = sshll.u32 %s278_s26, 4  ;;  %s167_s27 = int_to_ptr.vmem [resolvable:$true] %s166_s27 }
  0x20   :  { %97 = vmatpush1.msra.mxu0 %v59_v2  ;;  %189 = vmatpush1.msra.mxu1 %v59_v2  ;;  %v52_v9 = vld [vmem:[#allocation5 + $0x38] sm:$0xff]  ;;  %v51_v10 = vld [vmem:[#allocation5 + $0x30] sm:$0xff]  ;;  %v50_v11 = vld [vmem:[#allocation5 + $0x28] sm:$0xff]  ;;  %p250_p11 = scmp.lt.s32.totalorder %s167_s27, %s167_s27 }
  0x21   :  { %98 = vmatprep.subr.mxu0 %v58_v3  ;;  %182 = vmatprep.subr.mxu1 %v58_v3  ;;  %v49_v12 = vld [vmem:[#allocation5 + $0x20] sm:$0xff]  ;;  %v48_v13 = vld [vmem:[#allocation5 + $0x18] sm:$0xff]  ;;  %v47_v14 = vld [vmem:[#allocation5 + $0x10] sm:$0xff]  ;;  %v65_v21 = vsub.s32 0, %v64_v20  ;;  %v69_v23 = vsub.s32 1, %v64_v20 }
  0x22   :  { %99 = vmatpush1.msra.mxu0 %v57_v4  ;;  %190 = vmatpush1.msra.mxu1 %v57_v4  ;;  %v46_v15 = vld [vmem:[#allocation5 + $0x8] sm:$0xff]  ;;  %v45_v16 = vld [vmem:[#allocation5] sm:$0xff]  ;;  %v43_v17 = vld [vmem:[#allocation2] sm:$0xff] }
  0x23   :  { %100 = vmatprep.subr.mxu0 %v56_v5  ;;  %183 = vmatprep.subr.mxu1 %v56_v5  ;;  %v44_v18 = vld [vmem:[#allocation2 + $0x8] sm:$0xff]  ;;  %v61_v22 = vld [vmem:[%s323_s2] sm:$0x3]  ;;  %s245_s2 = scalar_lea.vmem %s167_s27, 512 }
  0x24   :  { %101 = vmatpush1.msra.mxu0 %v55_v6  ;;  %191 = vmatpush1.msra.mxu1 %v55_v6  ;;  %v66_v24 = vrot.slane %v61_v22, %v65_v21  ;;  %v70_v25 = vrot.slane %v61_v22, %v69_v23  ;;  %p246_p10 = scmp.ne.s32.totalorder %s167_s27, %s245_s2  ;;  %p251_p12 = scmp.lt.s32.totalorder %s245_s2, %s245_s2 }
  0x25   :  { %102 = vmatprep.subr.mxu0 %v54_v7  ;;  %184 = vmatprep.subr.mxu1 %v54_v7 }
  0x26   :  { %103 = vmatpush1.msra.mxu0 %v53_v8  ;;  %192 = vmatpush1.msra.mxu1 %v53_v8  ;;  %p252_p13 = por %p251_p12, %p250_p11 }
  0x27   :  { %104 = vmatprep.subr.mxu0 %v52_v9  ;;  %185 = vmatprep.subr.mxu1 %v52_v9 }
  0x28   :  { %105 = vmatpush1.msra.mxu0 %v51_v10  ;;  %193 = vmatpush1.msra.mxu1 %v51_v10  ;;  %p253_p0 = pnand %p252_p13, %p246_p10 }
  0x29   :  { %106 = vmatprep.subr.mxu0 %v50_v11  ;;  %186 = vmatprep.subr.mxu1 %v50_v11 }
  0x2a   :  { %107 = vmatpush1.msra.mxu0 %v49_v12  ;;  %194 = vmatpush1.msra.mxu1 %v49_v12 }
  0x2b   :  { %108 = vmatprep.subr.mxu0 %v48_v13  ;;  %187 = vmatprep.subr.mxu1 %v48_v13 }
  0x2c   :  { %109 = vmatpush1.msra.mxu0 %v47_v14  ;;  %195 = vmatpush1.msra.mxu1 %v47_v14 }
  0x2d   :  { %110 = vmatprep.subr.mxu0 %v46_v15  ;;  %188 = vmatprep.subr.mxu1 %v46_v15 }
  0x2e   :  { %111 = vmatpush1.msra.mxu0 %v45_v16  ;;  %196 = vmatpush1.msra.mxu1 %v45_v16 }
  0x2f   :  { %179 = vmatmul.mubr.msk.f32.vlgmr.msra.gmra.mxu0 %vm73_vm0, %v43_v17  ;;  %180 = vmatmul.mubr.msk.f32.vlgmr.msra.gmra.mxu1 %vm73_vm0, %v44_v18 }
  0xef   :  { %v146_v26 = vpop.f32.mrf.mxu0  ;;  %v152_v27 = vpop.f32.mrf.mxu1 }
  0xf0   :  { %v147_v28 = vadd.f32 %v146_v26, %v66_v24  ;;  %v153_v29 = vadd.f32 %v152_v27, %v66_v24 }
  0xf1   :  { %v148_v30 = vpop.f32.mrf.mxu0  ;;  %v154_v31 = vpop.f32.mrf.mxu1 }
  0xf2   :  { %157 = vst [vmem:[#allocation7] sm:$0xff] %v147_v28  ;;  %159 = vst [vmem:[#allocation7 + $0x10] sm:$0xff] %v153_v29  ;;  %v149_v32 = vadd.f32 %v148_v30, %v70_v25  ;;  %v155_v33 = vadd.f32 %v154_v31, %v70_v25 }
  0xf4   :  { %158 = vst.msk [vmem:[#allocation7 + $0x8] sm:$0xff] %vm73_vm0, %v149_v32  ;;  %160 = vst.msk [vmem:[#allocation7 + $0x18] sm:$0xff] %vm73_vm0, %v155_v33 }
  0xf5   :  { %256 = shalt.err (!%p253_p0)
}
  0xf6   :  { %172 = dma.vmem_to_hbm [thread:$0]  %s167_s27, 512, %s324_s3, [#allocation4], %s275_s22, %s275_s22, %s276_s23  }
  0xf7   :  { %269 = dma.done.wait [#allocation4], 512  }
  0xf8   :  { %270 = vsyncadd [#allocation4], 4294966784 }
  0xf9   :  { %176 = vsyncpa [#allocation3], 1 }
  0xfa   :  { %177 = vsyncpa [#allocation6], 1 }
  0xfb   :  { %178 = vsyncpa [#allocation4], 1 }

</bundles_post_ra>
